<compile_context>
chip_gen: v5e
topology: v5e:2x2
jax: 0.10.0
libtpu: 0.0.40
codegen_flags: <defaults>
</compile_context>

<pallas_src>
import functools

import jax
import jax.numpy as jnp
from jax.experimental import pallas as pl
from jax.experimental.pallas import tpu as pltpu


def _round_up(v, m):
    return ((v + m - 1) // m) * m


def _linear_lsq_kernel(x_ref, wq_ref, b_ref, o_ref, acc_ref):
    """One (i, j, k) grid step: acc[i,j] += x[i,k] @ w_q[k,j]; bias on last k."""
    k = pl.program_id(2)

    @pl.when(k == 0)
    def _init():
        acc_ref[...] = jnp.zeros_like(acc_ref)

    acc_ref[...] += jnp.dot(
        x_ref[...], wq_ref[...], preferred_element_type=jnp.float32
    )

    @pl.when(k == pl.num_programs(2) - 1)
    def _finalize():
        o_ref[...] = (acc_ref[...] + b_ref[...]).astype(o_ref.dtype)


def fake_quantize_weight(weight, nbits_w):
    """Global-min/max fake quantization (LinearLSQ.quantize), exact f32 math."""
    qmin = -(2 ** (nbits_w - 1))
    qmax = 2 ** (nbits_w - 1) - 1
    w = weight.astype(jnp.float32)
    w_min = jnp.min(w)
    w_max = jnp.max(w)
    scale = jnp.maximum((w_max - w_min) / jnp.float32(qmax - qmin),
                        jnp.float32(1e-8))
    zp = jnp.float32(qmin) - w_min / scale
    # jnp.round is round-half-to-even, matching torch.round.
    q = jnp.clip(jnp.round(w / scale + zp), jnp.float32(qmin), jnp.float32(qmax))
    return (q - zp) * scale


def linear_lsq(x, weight, bias, nbits_w, *, tm=512, tn=512, tk=1024,
               mxu_dtype=jnp.bfloat16):
    """Fake-quantized linear layer (LinearLSQ.forward).

    x:      [..., K] float
    weight: [N, K]   float (torch.nn.Linear layout)
    bias:   [N]      float or None
    """
    orig_shape = x.shape
    K = orig_shape[-1]
    N, Kw = weight.shape
    assert Kw == K, "weight must be [out_features, in_features]"

    # MXU operand dtype cast happens once here (not per tile in the kernel).
    x2d = x.reshape(-1, K).astype(mxu_dtype)
    M = x2d.shape[0]

    # Fake-quantize the weight ONCE in the wrapper (exact f32), then transpose
    # to [K, N] and cast to bf16 for the MXU.  Kernel does no quant work.
    w_q = fake_quantize_weight(weight, nbits_w)
    wq_t = w_q.T.astype(mxu_dtype)                         # [K, N]

    if bias is None:
        bias = jnp.zeros((N,), jnp.float32)
    b2d = bias.astype(jnp.float32).reshape(1, N)

    # Tile sizes: clamp to padded problem size; lane dims stay multiples of 128.
    tm = min(tm, _round_up(M, 8))
    tn = min(tn, _round_up(N, 128))
    tk = min(tk, _round_up(K, 128))

    # v7x megacore: make sure at least one "parallel" grid axis has >= 2
    # programs, otherwise one TensorCore idles.  No-op when grid already > 1.
    def _n_blocks(dim, t):
        return _round_up(dim, t) // t
    if _n_blocks(M, tm) == 1 and _n_blocks(N, tn) == 1:
        if tn > 128:
            tn = max(128, _round_up(tn // 2, 128))
        elif tm > 8:
            tm = max(8, _round_up(tm // 2, 8))

    Mp, Np, Kp = _round_up(M, tm), _round_up(N, tn), _round_up(K, tk)

    # Pad AFTER quantizing: zero-padded K columns of x meet zero-padded K rows
    # of w_q (contribute nothing); padded M rows / N cols are sliced off below.
    if (Mp, Kp) != (M, K):
        x2d = jnp.pad(x2d, ((0, Mp - M), (0, Kp - K)))
    if (Kp, Np) != (K, N):
        wq_t = jnp.pad(wq_t, ((0, Kp - K), (0, Np - N)))
    if Np != N:
        b2d = jnp.pad(b2d, ((0, 0), (0, Np - N)))

    out_dtype = x.dtype
    in_bytes = jnp.dtype(mxu_dtype).itemsize
    out_bytes = jnp.dtype(out_dtype).itemsize
    # double-buffered x, w tiles + bias + double-buffered out tile + f32 acc
    vmem_est = (2 * tm * tk * in_bytes + 2 * tk * tn * in_bytes
                + 2 * tn * 4 + 2 * tm * tn * out_bytes + tm * tn * 4)
    # Explicit limit: at least the v6e/v7x scoped default, never above v7x's
    # 64 MiB physical VMEM.
    vmem_limit = int(min(64 * 2 ** 20, max(32 * 2 ** 20, 2 * vmem_est)))

    out = pl.pallas_call(
        _linear_lsq_kernel,
        out_shape=jax.ShapeDtypeStruct((Mp, Np), out_dtype),
        grid_spec=pltpu.PrefetchScalarGridSpec(
            num_scalar_prefetch=0,
            grid=(Mp // tm, Np // tn, Kp // tk),
            in_specs=[
                pl.BlockSpec((tm, tk), lambda i, j, k: (i, k)),   # x tile (bf16)
                pl.BlockSpec((tk, tn), lambda i, j, k: (k, j)),   # w_q.T tile (bf16)
                pl.BlockSpec((1, tn), lambda i, j, k: (0, j)),    # bias tile (f32)
            ],
            out_specs=pl.BlockSpec((tm, tn), lambda i, j, k: (i, j)),
            scratch_shapes=[pltpu.VMEM((tm, tn), jnp.float32)],   # f32 acc
        ),
        compiler_params=pltpu.CompilerParams(
            dimension_semantics=("parallel", "parallel", "arbitrary"),
            vmem_limit_bytes=vmem_limit,
        ),
    )(x2d, wq_t, b2d)

    out = out[:M, :N]
    return out.reshape(*orig_shape[:-1], N)


# ----------------------------- references ----------------------------------
def _reference_f32(x, weight, bias, nbits_w):
    """Exact PyTorch-semantics reference, all-f32 matmul."""
    w_q = fake_quantize_weight(weight, nbits_w)
    return x @ w_q.T + bias


def _reference_mxu(x, weight, bias, nbits_w, mxu_dtype=jnp.bfloat16):
    """Same math as the kernel: bf16 MXU operands, f32 accumulation."""
    w_q = fake_quantize_weight(weight, nbits_w)
    x2 = x.reshape(-1, x.shape[-1])
    out = jnp.dot(x2.astype(mxu_dtype), w_q.T.astype(mxu_dtype),
                  preferred_element_type=jnp.float32) + bias
    return out.reshape(*x.shape[:-1], weight.shape[0])


if __name__ == "__main__":
    # Small shapes consistent with nn.Linear: batch=2, seq=7 (odd, exercises
    # M padding), in_features K=384, out_features N=256, 4-bit weights.
    B, S, K, N = 2, 7, 384, 256
    nbits_w = 4

    key = jax.random.PRNGKey(0)
    kx, kw, kb = jax.random.split(key, 3)
    x = jax.random.normal(kx, (B, S, K), dtype=jnp.float32)
    weight = jax.random.normal(kw, (N, K), dtype=jnp.float32) * 0.1   # [out, in]
    bias = jax.random.normal(kb, (N,), dtype=jnp.float32) * 0.01

    # Default (large) tiles under one jit (fuses the quant/transpose/pad with
    # the kernel launch).  Megacore split kicks in -> grid (1, 2, 1).
    linear_jit = jax.jit(functools.partial(linear_lsq, nbits_w=nbits_w))
    out = jax.block_until_ready(linear_jit(x, weight, bias))

    # Small tiles: exercise the full (i, j, k) grid, padding and accumulator.
    out_tiled = linear_lsq(x, weight, bias, nbits_w, tm=8, tn=128, tk=128)
    out_tiled = jax.block_until_ready(out_tiled)

    ref_mxu = _reference_mxu(x, weight, bias, nbits_w)
    ref_f32 = _reference_f32(x, weight, bias, nbits_w)

    assert out.shape == (B, S, N), out.shape
    # Tight check vs a reference using identical (bf16-operand) matmul math.
    assert jnp.allclose(out, ref_mxu, atol=2e-3, rtol=2e-3), "mismatch vs bf16 reference"
    assert jnp.allclose(out_tiled, ref_mxu, atol=2e-3, rtol=2e-3), "tiled mismatch vs bf16 reference"
    # Looser check vs the exact f32 PyTorch-semantics reference (bf16 operand cast).
    assert jnp.allclose(out, ref_f32, atol=5e-2, rtol=5e-2), "mismatch vs f32 reference"

    print("KERNEL_OK")
</pallas_src>

<mosaic_0001>
module attributes {stable_mosaic.version = 11 : i64} {
  func.func @_linear_lsq_kernel(%arg0: i32, %arg1: i32, %arg2: i32, %arg3: memref<16x384xbf16, #tpu.memory_space<vmem>>, %arg4: memref<384x128xbf16, #tpu.memory_space<vmem>>, %arg5: memref<1x128xf32, #tpu.memory_space<vmem>>, %arg6: memref<16x128xf32, #tpu.memory_space<vmem>>, %arg7: memref<16x128xf32, #tpu.memory_space<vmem>>) attributes {dimension_semantics = [#tpu.dimension_semantics<parallel>, #tpu.dimension_semantics<parallel>, #tpu.dimension_semantics<arbitrary>], iteration_bounds = array<i64: 1, 2, 1>, scalar_prefetch = 0 : i64, scratch_operands = 1 : i64, tpu.core_type = #tpu.core_type<tc>, window_params = [{transform_indices = @transform_0, window_bounds = array<i64: 16, 384>}, {transform_indices = @transform_1, window_bounds = array<i64: 384, 128>}, {transform_indices = @transform_2, window_bounds = array<i64: 1, 128>}, {transform_indices = @transform_3, window_bounds = array<i64: 16, 128>}]} {
    %c0_i32 = arith.constant 0 : i32
    %0 = arith.cmpi eq, %arg2, %c0_i32 : i32
    %1 = arith.extui %0 : i1 to i32
    %c0_i32_0 = arith.constant 0 : i32
    %2 = arith.cmpi ne, %1, %c0_i32_0 : i32
    scf.if %2 {
      %cst_10 = arith.constant 0.000000e+00 : f32
      %12 = vector.broadcast %cst_10 : f32 to vector<16x128xf32>
      %c0_11 = arith.constant 0 : index
      %c0_12 = arith.constant 0 : index
      %13 = vector.load %arg7[%c0_11, %c0_12] : memref<16x128xf32, #tpu.memory_space<vmem>>, vector<16x128xf32>
      tpu.vector_store %arg7[%c0_11, %c0_12], %12 {strides = array<i32>} : memref<16x128xf32, #tpu.memory_space<vmem>>, vector<16x128xf32>,
    } else {
    }
    %c0 = arith.constant 0 : index
    %c0_1 = arith.constant 0 : index
    %3 = vector.load %arg7[%c0, %c0_1] : memref<16x128xf32, #tpu.memory_space<vmem>>, vector<16x128xf32>
    %c0_2 = arith.constant 0 : index
    %c0_3 = arith.constant 0 : index
    %4 = vector.load %arg3[%c0_2, %c0_3] : memref<16x384xbf16, #tpu.memory_space<vmem>>, vector<16x384xbf16>
    %c0_4 = arith.constant 0 : index
    %c0_5 = arith.constant 0 : index
    %5 = vector.load %arg4[%c0_4, %c0_5] : memref<384x128xbf16, #tpu.memory_space<vmem>>, vector<384x128xbf16>
    %cst = arith.constant dense<0.000000e+00> : vector<16x128xf32>
    %6 = tpu.matmul %4, %5, %cst {dimension_numbers = #tpu.dot_dimension_numbers<[1], [0], [0], [1], [0, 0, 1, 1], [], []>} : vector<16x384xbf16>, vector<384x128xbf16>, vector<16x128xf32> -> vector<16x128xf32>
    %7 = arith.addf %3, %6 : vector<16x128xf32>
    %c0_6 = arith.constant 0 : index
    %c0_7 = arith.constant 0 : index
    %8 = vector.load %arg7[%c0_6, %c0_7] : memref<16x128xf32, #tpu.memory_space<vmem>>, vector<16x128xf32>
    tpu.vector_store %arg7[%c0_6, %c0_7], %7 {strides = array<i32>} : memref<16x128xf32, #tpu.memory_space<vmem>>, vector<16x128xf32>,
    %c0_i32_8 = arith.constant 0 : i32
    %9 = arith.cmpi eq, %arg2, %c0_i32_8 : i32
    %10 = arith.extui %9 : i1 to i32
    %c0_i32_9 = arith.constant 0 : i32
    %11 = arith.cmpi ne, %10, %c0_i32_9 : i32
    scf.if %11 {
      %c0_10 = arith.constant 0 : index
      %c0_11 = arith.constant 0 : index
      %12 = vector.load %arg7[%c0_10, %c0_11] : memref<16x128xf32, #tpu.memory_space<vmem>>, vector<16x128xf32>
      %c0_12 = arith.constant 0 : index
      %c0_13 = arith.constant 0 : index
      %13 = vector.load %arg5[%c0_12, %c0_13] : memref<1x128xf32, #tpu.memory_space<vmem>>, vector<1x128xf32>
      %14 = vector.broadcast %13 : vector<1x128xf32> to vector<16x128xf32>
      %15 = arith.addf %12, %14 : vector<16x128xf32>
      %c0_14 = arith.constant 0 : index
      %c0_15 = arith.constant 0 : index
      %16 = vector.load %arg6[%c0_14, %c0_15] : memref<16x128xf32, #tpu.memory_space<vmem>>, vector<16x128xf32>
      tpu.vector_store %arg6[%c0_14, %c0_15], %15 {strides = array<i32>} : memref<16x128xf32, #tpu.memory_space<vmem>>, vector<16x128xf32>,
    } else {
    }
    return
  }
  func.func @transform_0(%arg0: i32, %arg1: i32, %arg2: i32) -> (i32, i32) {
    %c0_i32 = arith.constant 0 : i32
    return %arg0, %arg2 : i32, i32
  }
  func.func @transform_1(%arg0: i32, %arg1: i32, %arg2: i32) -> (i32, i32) {
    %c0_i32 = arith.constant 0 : i32
    return %arg2, %arg1 : i32, i32
  }
  func.func @transform_2(%arg0: i32, %arg1: i32, %arg2: i32) -> (i32, i32) {
    %c0_i32 = arith.constant 0 : i32
    %c0_i32_0 = arith.constant 0 : i32
    return %c0_i32, %arg1 : i32, i32
  }
  func.func @transform_3(%arg0: i32, %arg1: i32, %arg2: i32) -> (i32, i32) {
    %c0_i32 = arith.constant 0 : i32
    return %arg0, %arg1 : i32, i32
  }
}

</mosaic_0001>

<bundles_post_ra>
// kernel: linear_lsq.1
= control target key start
LH: loop header
LB: loop body
LE: loop exit
PB: predicated region body
PF: predicated region fallthrough
CT: control target
= control target key end

     0   :  { %s1159_s12 = smov 0   ;;  %s1161_s13 = smov 0   ;;  %s1384_s0 = inlined_call_operand.vmem [shape: bf16[16,384], index: 0, kind: input, shape index: {}]   ;;  %s1385_s1 = inlined_call_operand.vmem [shape: bf16[384,256], index: 1, kind: input, shape index: {}]   ;;  %s1386_s2 = inlined_call_operand.vmem [shape: f32[1,256], index: 2, kind: input, shape index: {}]   ;;  %s1387_s3 = inlined_call_operand.vmem [shape: f32[16,256], index: 3, kind: output, shape index: {}]  }
   0x1   :  { %s1163_s14 = smov 0   ;;  %s1165_s15 = smov 0  }
   0x2   :  { %s1167_s16 = smov 0  }
   0x3 LB: > { %s28_s17 = sadd.s32 1, %s1133_s15  ;;  %s909_s18 = sadd.s32 4294967295, %s1137_s16   ;;  %s1137_s16 = sphi %s1167_s16, %s13_s16   ;;  %s1133_s15 = sphi %s1165_s15, %s1392_s15   ;;  %s1129_s14 = sphi %s1163_s14, %s1391_s14   ;;  %s1125_s13 = sphi %s1161_s13, %s1390_s13   ;;  %s1121_s12 = sphi %s1159_s12, %s1389_s12  }
   0x4   : > { %p30_p0 = scmp.ge.s32.totalorder %s28_s17, 2  ;;  %p76_p1 = scmp.ne.s32.totalorder %s1125_s13, %s1121_s12 }
   0x5   : > { %p77_p2 = scmp.eq.s32.totalorder %s1137_s16, 0  ;;  %p134_p4 = scmp.eq.s32.totalorder %s909_s18, 1 }
   0x6   : > { %s1394_s17 = smov (%p30_p0, %s28_s17), 0  ;;  %s69_s20 = sadd.s32 1, %s1125_s13 }
   0x7   : > { %p78_p3 = por %p77_p2, %p76_p1  ;;  %s65_s19 = ssub.s32 %s1133_s15, %s1394_s17 }
   0x8   : > { %p67_p5 = scmp.eq.s32.totalorder %s65_s19, 0  ;;  %p1194_p6 = por %p134_p4, %p76_p1 }
   0x9   : > { %p913_p7 = scmp.ge.s32.totalorder %s1137_s16, 2 }
   0xa   : > { %s1199_s22 = scalar_select %p67_p5, %s1125_s13, %s69_s20  }
   0xb   : > { %171 = sbr.rel (%p913_p7) target bundleno = 69 (0x45), region = 20 }
  0x10   : > { %174 = sbr.rel (!%p78_p3) target bundleno = 69 (0x45), region = 24  ;;  %s176_s23 = sand.u32 (%p78_p3), 1, %s1125_s13  }
  0x11   : > { %s914_s24 = sshll.u32 (%p78_p3), %s1133_s15, 2  ;;  %s1056_s25 = smul.u32 (%p78_p3), 192, %s176_s23 }
  0x12   : > { %s1207_s28 = scalar_lea.vmem (%p78_p3), %s1385_s1, %s914_s24 }
  0x13   : > { %v200_v0 = vld [vmem:[%s1207_s28] sm:$0xf] (%p78_p3)  ;;  %v202_v1 = vld [vmem:[%s1207_s28 + $0x8] sm:$0xf] (%p78_p3)  ;;  %v204_v2 = vld [vmem:[%s1207_s28 + $0x10] sm:$0xf] (%p78_p3) }
  0x14   : > { %s1212_s29 = scalar_lea.vmem (%p78_p3), [#allocation3], %s1056_s25  ;;  %v206_v3 = vld [vmem:[%s1207_s28 + $0x18] sm:$0xf] (%p78_p3)  ;;  %v208_v4 = vld [vmem:[%s1207_s28 + $0x20] sm:$0xf] (%p78_p3) }
  0x15   : > { %201 = vst [vmem:[%s1212_s29] sm:$0xf] %v200_v0  ;;  %v210_v5 = vld [vmem:[%s1207_s28 + $0x28] sm:$0xf]  ;;  %v212_v6 = vld [vmem:[%s1207_s28 + $0x30] sm:$0xf] }
  0x16   : > { %203 = vst [vmem:[%s1212_s29 + $0x4] sm:$0xf] %v202_v1  ;;  %v214_v7 = vld [vmem:[%s1207_s28 + $0x38] sm:$0xf]  ;;  %v216_v8 = vld [vmem:[%s1207_s28 + $0x40] sm:$0xf] }
  0x17   : > { %205 = vst [vmem:[%s1212_s29 + $0x8] sm:$0xf] %v204_v2  ;;  %v218_v9 = vld [vmem:[%s1207_s28 + $0x48] sm:$0xf]  ;;  %v220_v10 = vld [vmem:[%s1207_s28 + $0x50] sm:$0xf] }
  0x18   : > { %207 = vst [vmem:[%s1212_s29 + $0xc] sm:$0xf] %v206_v3  ;;  %v222_v11 = vld [vmem:[%s1207_s28 + $0x58] sm:$0xf]  ;;  %v224_v12 = vld [vmem:[%s1207_s28 + $0x60] sm:$0xf] }
  0x19   : > { %209 = vst [vmem:[%s1212_s29 + $0x10] sm:$0xf] %v208_v4  ;;  %v226_v13 = vld [vmem:[%s1207_s28 + $0x68] sm:$0xf]  ;;  %v228_v14 = vld [vmem:[%s1207_s28 + $0x70] sm:$0xf] }
  0x1a   : > { %211 = vst [vmem:[%s1212_s29 + $0x14] sm:$0xf] %v210_v5  ;;  %v230_v15 = vld [vmem:[%s1207_s28 + $0x78] sm:$0xf]  ;;  %v232_v16 = vld [vmem:[%s1207_s28 + $0x80] sm:$0xf] }
  0x1b   : > { %213 = vst [vmem:[%s1212_s29 + $0x18] sm:$0xf] %v212_v6  ;;  %v234_v17 = vld [vmem:[%s1207_s28 + $0x88] sm:$0xf]  ;;  %v236_v18 = vld [vmem:[%s1207_s28 + $0x90] sm:$0xf] }
  0x1c   : > { %215 = vst [vmem:[%s1212_s29 + $0x1c] sm:$0xf] %v214_v7  ;;  %v238_v19 = vld [vmem:[%s1207_s28 + $0x98] sm:$0xf]  ;;  %v240_v20 = vld [vmem:[%s1207_s28 + $0xa0] sm:$0xf] }
  0x1d   : > { %217 = vst [vmem:[%s1212_s29 + $0x20] sm:$0xf] %v216_v8  ;;  %v242_v21 = vld [vmem:[%s1207_s28 + $0xa8] sm:$0xf]  ;;  %v244_v22 = vld [vmem:[%s1207_s28 + $0xb0] sm:$0xf] }
  0x1e   : > { %219 = vst [vmem:[%s1212_s29 + $0x24] sm:$0xf] %v218_v9  ;;  %v246_v23 = vld [vmem:[%s1207_s28 + $0xb8] sm:$0xf]  ;;  %v248_v24 = vld [vmem:[%s1207_s28 + $0xc0] sm:$0xf] }
  0x1f   : > { %221 = vst [vmem:[%s1212_s29 + $0x28] sm:$0xf] %v220_v10  ;;  %v250_v25 = vld [vmem:[%s1207_s28 + $0xc8] sm:$0xf]  ;;  %v252_v26 = vld [vmem:[%s1207_s28 + $0xd0] sm:$0xf] }
  0x20   : > { %223 = vst [vmem:[%s1212_s29 + $0x2c] sm:$0xf] %v222_v11  ;;  %v254_v27 = vld [vmem:[%s1207_s28 + $0xd8] sm:$0xf]  ;;  %v256_v28 = vld [vmem:[%s1207_s28 + $0xe0] sm:$0xf] }
  0x21   : > { %225 = vst [vmem:[%s1212_s29 + $0x30] sm:$0xf] %v224_v12  ;;  %v258_v29 = vld [vmem:[%s1207_s28 + $0xe8] sm:$0xf]  ;;  %v260_v30 = vld [vmem:[%s1207_s28 + $0xf0] sm:$0xf] }
  0x22   : > { %227 = vst [vmem:[%s1212_s29 + $0x34] sm:$0xf] %v226_v13  ;;  %v262_v31 = vld [vmem:[%s1207_s28 + $0xf8] sm:$0xf]  ;;  %v264_v32 = vld [vmem:[%s1207_s28 + $0x100] sm:$0xf] }
  0x23   : > { %229 = vst [vmem:[%s1212_s29 + $0x38] sm:$0xf] %v228_v14  ;;  %v266_v33 = vld [vmem:[%s1207_s28 + $0x108] sm:$0xf]  ;;  %v268_v34 = vld [vmem:[%s1207_s28 + $0x110] sm:$0xf] }
  0x24   : > { %231 = vst [vmem:[%s1212_s29 + $0x3c] sm:$0xf] %v230_v15  ;;  %v270_v35 = vld [vmem:[%s1207_s28 + $0x118] sm:$0xf]  ;;  %v272_v36 = vld [vmem:[%s1207_s28 + $0x120] sm:$0xf] }
  0x25   : > { %233 = vst [vmem:[%s1212_s29 + $0x40] sm:$0xf] %v232_v16  ;;  %v274_v37 = vld [vmem:[%s1207_s28 + $0x128] sm:$0xf]  ;;  %v276_v38 = vld [vmem:[%s1207_s28 + $0x130] sm:$0xf] }
  0x26   : > { %235 = vst [vmem:[%s1212_s29 + $0x44] sm:$0xf] %v234_v17  ;;  %v278_v39 = vld [vmem:[%s1207_s28 + $0x138] sm:$0xf]  ;;  %v280_v40 = vld [vmem:[%s1207_s28 + $0x140] sm:$0xf] }
  0x27   : > { %237 = vst [vmem:[%s1212_s29 + $0x48] sm:$0xf] %v236_v18  ;;  %v282_v41 = vld [vmem:[%s1207_s28 + $0x148] sm:$0xf]  ;;  %v284_v42 = vld [vmem:[%s1207_s28 + $0x150] sm:$0xf] }
  0x28   : > { %239 = vst [vmem:[%s1212_s29 + $0x4c] sm:$0xf] %v238_v19  ;;  %v286_v43 = vld [vmem:[%s1207_s28 + $0x158] sm:$0xf]  ;;  %v288_v44 = vld [vmem:[%s1207_s28 + $0x160] sm:$0xf] }
  0x29   : > { %241 = vst [vmem:[%s1212_s29 + $0x50] sm:$0xf] %v240_v20  ;;  %v290_v45 = vld [vmem:[%s1207_s28 + $0x168] sm:$0xf]  ;;  %v292_v46 = vld [vmem:[%s1207_s28 + $0x170] sm:$0xf] }
  0x2a   : > { %243 = vst [vmem:[%s1212_s29 + $0x54] sm:$0xf] %v242_v21  ;;  %v294_v47 = vld [vmem:[%s1207_s28 + $0x178] sm:$0xf] }
  0x2b   : > { %245 = vst [vmem:[%s1212_s29 + $0x58] sm:$0xf] %v244_v22 }
  0x2c   : > { %247 = vst [vmem:[%s1212_s29 + $0x5c] sm:$0xf] %v246_v23 }
  0x2d   : > { %249 = vst [vmem:[%s1212_s29 + $0x60] sm:$0xf] %v248_v24 }
  0x2e   : > { %251 = vst [vmem:[%s1212_s29 + $0x64] sm:$0xf] %v250_v25 }
  0x2f   : > { %253 = vst [vmem:[%s1212_s29 + $0x68] sm:$0xf] %v252_v26 }
  0x30   : > { %255 = vst [vmem:[%s1212_s29 + $0x6c] sm:$0xf] %v254_v27 }
  0x31   : > { %257 = vst [vmem:[%s1212_s29 + $0x70] sm:$0xf] %v256_v28 }
  0x32   : > { %259 = vst [vmem:[%s1212_s29 + $0x74] sm:$0xf] %v258_v29 }
  0x33   : > { %261 = vst [vmem:[%s1212_s29 + $0x78] sm:$0xf] %v260_v30 }
  0x34   : > { %263 = vst [vmem:[%s1212_s29 + $0x7c] sm:$0xf] %v262_v31 }
  0x35   : > { %265 = vst [vmem:[%s1212_s29 + $0x80] sm:$0xf] %v264_v32 }
  0x36   : > { %267 = vst [vmem:[%s1212_s29 + $0x84] sm:$0xf] %v266_v33 }
  0x37   : > { %269 = vst [vmem:[%s1212_s29 + $0x88] sm:$0xf] %v268_v34 }
  0x38   : > { %271 = vst [vmem:[%s1212_s29 + $0x8c] sm:$0xf] %v270_v35 }
  0x39   : > { %273 = vst [vmem:[%s1212_s29 + $0x90] sm:$0xf] %v272_v36 }
  0x3a   : > { %275 = vst [vmem:[%s1212_s29 + $0x94] sm:$0xf] %v274_v37 }
  0x3b   : > { %277 = vst [vmem:[%s1212_s29 + $0x98] sm:$0xf] %v276_v38 }
  0x3c   : > { %279 = vst [vmem:[%s1212_s29 + $0x9c] sm:$0xf] %v278_v39 }
  0x3d   : > { %281 = vst [vmem:[%s1212_s29 + $0xa0] sm:$0xf] %v280_v40 }
  0x3e   : > { %283 = vst [vmem:[%s1212_s29 + $0xa4] sm:$0xf] %v282_v41 }
  0x3f   : > { %285 = vst [vmem:[%s1212_s29 + $0xa8] sm:$0xf] %v284_v42 }
  0x40   : > { %287 = vst [vmem:[%s1212_s29 + $0xac] sm:$0xf] %v286_v43 }
  0x41   : > { %289 = vst [vmem:[%s1212_s29 + $0xb0] sm:$0xf] %v288_v44 }
  0x42   : > { %291 = vst [vmem:[%s1212_s29 + $0xb4] sm:$0xf] %v290_v45 }
  0x43   : > { %293 = vst [vmem:[%s1212_s29 + $0xb8] sm:$0xf] %v292_v46 }
  0x44   : > { %295 = vst [vmem:[%s1212_s29 + $0xbc] sm:$0xf] %v294_v47 }
  0x45 PF: > { %p915_p8 = scmp.ge.s32.totalorder %s1137_s16, 1  ;;  %p420_p9 = scmp.lt.s32.totalorder %s1137_s16, 3 }
  0x47   : > { %p421_p10 = pnand %p915_p8, %p420_p9 }
  0x48   : > { %s427_s30 = sand.u32 (!%p421_p10), 1, %s1121_s12   ;;  %p475_p11 = scmp.lt.s32.totalorder (!%p421_p10), %s1129_s14, 1 }
  0x49   : > { %424 = sbr.rel (%p421_p10) target bundleno = 265 (0x109), region = 69 }
  0x4a   : > { %s1057_s4 = smul.u32 (!%p421_p10), 192, %s427_s30 }
  0x4c   : > { %s1312_s5 = scalar_lea.vmem (!%p421_p10), [#allocation3], %s1057_s4  ;;  %s916_s4 = sshll.u32 (!%p421_p10), %s427_s30, 4 }
  0x4e   : > { %v1039_v48 = vld [vmem:[%s1312_s5 + $0x38] sm:$0xff]  ;;  %v1038_v51 = vld [vmem:[%s1312_s5 + $0x30] sm:$0xff]  ;;  %v1037_v54 = vld [vmem:[%s1312_s5 + $0x28] sm:$0xff]  ;;  %s476_s26 = scalar_select %p475_p11, %s1129_s14, 1 }
  0x4f   : > { %v1047_v49 = vld [vmem:[%s1312_s5 + $0x78] sm:$0xff]  ;;  %699 = vmatpush.bf16.msra.mxu0 %v1039_v48  ;;  %v1046_v52 = vld [vmem:[%s1312_s5 + $0x70] sm:$0xff]  ;;  %v1045_v55 = vld [vmem:[%s1312_s5 + $0x68] sm:$0xff]  ;;  %s1026_s6 = sshll.u32 (%p1194_p6), %s1129_s14, 3 }
  0x50   : > { %v1055_v50 = vld [vmem:[%s1312_s5 + $0xb8] sm:$0xff]  ;;  %713 = vmatpush.bf16.msra.mxu1 %v1047_v49  ;;  %v1054_v53 = vld [vmem:[%s1312_s5 + $0xb0] sm:$0xff]  ;;  %v1053_v56 = vld [vmem:[%s1312_s5 + $0xa8] sm:$0xff]  ;;  %s477_s29 = scalar_lea.vmem %s1386_s2, %s476_s26  ;;  %s769_s7 = scalar_lea.vmem (%p1194_p6), %s1387_s3, %s1026_s6 }
  0x51   : > { %727 = vmatpush.bf16.msra.mxu2 %v1055_v50  ;;  %v1036_v57 = vld [vmem:[%s1312_s5 + $0x20] sm:$0xff]  ;;  %v1035_v60 = vld [vmem:[%s1312_s5 + $0x18] sm:$0xff]  ;;  %v1034_v63 = vld [vmem:[%s1312_s5 + $0x10] sm:$0xff] }
  0x52   : > { %v1044_v58 = vld [vmem:[%s1312_s5 + $0x60] sm:$0xff]  ;;  %v1043_v61 = vld [vmem:[%s1312_s5 + $0x58] sm:$0xff]  ;;  %v1042_v0 = vld [vmem:[%s1312_s5 + $0x50] sm:$0xff] }
  0x53   : > { %700 = vmatpush.bf16.msra.mxu0 %v1038_v51  ;;  %v1052_v59 = vld [vmem:[%s1312_s5 + $0xa0] sm:$0xff]  ;;  %v1051_v62 = vld [vmem:[%s1312_s5 + $0x98] sm:$0xff]  ;;  %v1050_v1 = vld [vmem:[%s1312_s5 + $0x90] sm:$0xff] }
  0x54   : > { %714 = vmatpush.bf16.msra.mxu1 %v1046_v52  ;;  %v1033_v2 = vld [vmem:[%s1312_s5 + $0x8] sm:$0xff]  ;;  %v1032_v5 = vld [vmem:[%s1312_s5] sm:$0xff]  ;;  %v921_v10 = vld [vmem:[%s1384_s0 + $0xc] sm:$0xf0] }
  0x55   : > { %728 = vmatpush.bf16.msra.mxu2 %v1054_v53  ;;  %v1041_v3 = vld [vmem:[%s1312_s5 + $0x48] sm:$0xff]  ;;  %v919_v6 = vld [vmem:[%s1384_s0] sm:$0xf]  ;;  %v1029_v9 = vld [vmem:[%s1384_s0 + $0x4] sm:$0xf] }
  0x56   : > { %v1049_v4 = vld [vmem:[%s1312_s5 + $0x88] sm:$0xff]  ;;  %v1040_v8 = vld [vmem:[%s1312_s5 + $0x40] sm:$0xff]  ;;  %v1031_v13 = vld [vmem:[%s1384_s0 + $0x10] sm:$0xf0]  ;;  %v924_v15 = vor.u32 %v1029_v9, %v921_v10 }
  0x57   : > { %701 = vmatpush.bf16.msra.mxu0 %v1037_v54  ;;  %v1030_v7 = vld [vmem:[%s1384_s0 + $0x8] sm:$0xf0]  ;;  %v1048_v11 = vld [vmem:[%s1312_s5 + $0x80] sm:$0xff]  ;;  %v927_v12 = vld [vmem:[%s1384_s0 + $0x8] sm:$0xf]  ;;  %s461_s5 = scalar_lea.vmem [#allocation4], %s916_s4 }
  0x58   : > { %715 = vmatpush.bf16.msra.mxu1 %v1045_v55  ;;  %v920_v14 = vor.u32 %v1030_v7, %v919_v6  ;;  %v928_v16 = vor.u32 %v1031_v13, %v927_v12  ;;  %v1098_v20 = vld [vmem:[%s477_s29] ss:$0 sm:$0xff] }
  0x59   : > { %729 = vmatpush.bf16.msra.mxu2 %v1053_v56 }
  0x5b   : > { %702 = vmatpush.bf16.msra.mxu0 %v1036_v57 }
  0x5c   : > { %716 = vmatpush.bf16.msra.mxu1 %v1044_v58 }
  0x5d   : > { %730 = vmatpush.bf16.msra.mxu2 %v1052_v59 }
  0x5f   : > { %703 = vmatpush.bf16.msra.mxu0 %v1035_v60 }
  0x60   : > { %717 = vmatpush.bf16.msra.mxu1 %v1043_v61 }
  0x61   : > { %731 = vmatpush.bf16.msra.mxu2 %v1051_v62 }
  0x63   : > { %704 = vmatpush.bf16.msra.mxu0 %v1034_v63 }
  0x64   : > { %718 = vmatpush.bf16.msra.mxu1 %v1042_v0 }
  0x65   : > { %732 = vmatpush.bf16.msra.mxu2 %v1050_v1 }
  0x67   : > { %705 = vmatpush.bf16.msra.mxu0 %v1033_v2 }
  0x68   : > { %719 = vmatpush.bf16.msra.mxu1 %v1041_v3 }
  0x69   : > { %733 = vmatpush.bf16.msra.mxu2 %v1049_v4 }
  0x6b   : > { %706 = vmatpush.bf16.msra.mxu0 %v1032_v5 }
  0x6c   : > { %720 = vmatpush.bf16.msra.mxu1 %v1040_v8 }
  0x6d   : > { %734 = vmatpush.bf16.msra.mxu2 %v1048_v11 }
  0x6e   : > { %707 = vmatmul.bf16.vlgmr.msra.gmra.mxu0 %v920_v14 }
  0x6f   : > { %721 = vmatmul.bf16.vlgmr.msra.gmra.mxu1 %v924_v15 }
  0x70   : > { %735 = vmatmul.bf16.vlgmr.msra.gmra.mxu2 %v928_v16 }
  0xeb   : > { %v708_v17 = vpop.f32.mrf.mxu0 }
  0xec   : > { %v722_v18 = vpop.f32.mrf.mxu1 }
  0xed   : > { %v723_v19 = vadd.f32 %v722_v18, %v708_v17 }
  0xf3   : > { %v736_v21 = vpop.f32.mrf.mxu2  ;;  %v710_v24 = vpop.f32.mrf.mxu0 }
  0xf4   : > { %v737_v22 = vadd.f32 %v736_v21, %v723_v19  ;;  %v724_v25 = vpop.f32.mrf.mxu1 }
  0xf5   : > { %v725_v26 = vadd.f32 %v724_v25, %v710_v24 }
  0xf6   : > { %v754_v23 = vadd.f32 %v1098_v20, %v737_v22 }
  0xf8   : > { %756 = vst [vmem:[%s461_s5] sm:$0xff] %v754_v23 }
  0xfb   : > { %v738_v27 = vpop.f32.mrf.mxu2 }
  0xfc   : > { %v739_v28 = vadd.f32 %v738_v27, %v725_v26  ;;  %764 = sbr.rel (!%p1194_p6) target bundleno = 265 (0x109), region = 85 }
  0xfe   : > { %v755_v29 = vadd.f32 %v1098_v20, %v739_v28 }
  0xff   : > { %v800_v30 = vld [vmem:[%s461_s5] sm:$0xff] (%p1194_p6) }
 0x100   : > { %757 = vst [vmem:[%s461_s5 + $0x8] sm:$0xff] %v755_v29 }
 0x101   : > { %801 = vst [vmem:[%s769_s7] sm:$0xff] %v800_v30 }
 0x107   : > { %v802_v31 = vld [vmem:[%s461_s5 + $0x8] sm:$0xff] }
 0x108   : > { %803 = vst [vmem:[%s769_s7 + $0x10] sm:$0xff] %v802_v31 }
 0x109 PF: > { %s13_s16 = sadd.s32 1, %s1137_s16   ;;  %s1389_s12 = smov %s1125_s13 }
 0x10a   : > { %p10_p12 = scmp.ge.s32.totalorder %s13_s16, 4   ;;  %s1390_s13 = smov %s1199_s22 }
 0x10b   : > { %s1391_s14 = smov %s1133_s15  ;;  %s1392_s15 = smov %s1394_s17 }
 0x10c   :  { %12 = sbr.rel (!%p10_p12) target bundleno = 3 (0x3), region = 160 }

</bundles_post_ra>
